<compile_context>
chip_gen: v5e
topology: v5e:2x2
jax: 0.10.0
libtpu: 0.0.40
codegen_flags: <defaults>
</compile_context>

<pallas_src>
import jax
import jax.numpy as jnp
from jax import lax
from jax.experimental import pallas as pl
from jax.experimental.pallas import tpu as pltpu

LANE = 128            # padded feature width of the hidden layers
ACTION_DIM = 3
OUT_PAD = 8           # 2*ACTION_DIM = 6 -> padded to 8 output lanes
TILE_B_MAX = 2048     # batch tile; ~1 MiB of f32 activations per live temp


def _round_up(n, m):
    return ((n + m - 1) // m) * m


def _policy_kernel(x_ref, w0_ref, w_ref, b_ref, wout_ref, bout_ref, out_ref):
    """Fused 6-layer MLP.

    x_ref    : (TILE_B, OBS_PAD)  f32
    w0_ref   : (OBS_PAD, LANE)    bf16   layer 0 weight
    w_ref    : (4, LANE, LANE)    bf16   layers 1..4 weights
    b_ref    : (5, 1, LANE)       f32    layers 0..4 biases
    wout_ref : (LANE, OUT_PAD)    bf16   layer 5 (fc3) weight
    bout_ref : (1, OUT_PAD)       f32    layer 5 (fc3) bias
    out_ref  : (TILE_B, OUT_PAD)  f32    lanes [0:3]=mu, [3:6]=sigma
    """
    # Layer 0 (pre_lstm fc1) directly on the un-padded obs lanes.
    h = jnp.dot(x_ref[...].astype(jnp.bfloat16), w0_ref[...],
                preferred_element_type=jnp.float32) + b_ref[0]
    h = jnp.maximum(h, 0.0)

    def dense(h, k):  # k is a static Python int
        return jnp.dot(h.astype(jnp.bfloat16), w_ref[k],
                       preferred_element_type=jnp.float32) + b_ref[k + 1]

    h = jnp.maximum(dense(h, 0), 0.0)   # pre_lstm fc2 + ReLU
    h = dense(h, 1)                     # pre_lstm fc3 -> features (128)
    h = jnp.tanh(dense(h, 2))           # policy fc1 + tanh
    h = jnp.tanh(dense(h, 3))           # policy fc2 + tanh

    # Policy fc3: only OUT_PAD lanes are produced / stored.
    z = jnp.dot(h.astype(jnp.bfloat16), wout_ref[...],
                preferred_element_type=jnp.float32) + bout_ref[...]

    lane = lax.broadcasted_iota(jnp.int32, z.shape, 1)
    out_ref[...] = jnp.where(lane < ACTION_DIM, jnp.tanh(z), jax.nn.sigmoid(z))


def pack_policy_params(params, obs_dim, action_dim=ACTION_DIM):
    """Pack the 6 linear layers into bf16 weight slabs + f32 bias slab.

    Returns (w0, w_slab, b_slab, w_out, b_out):
      w0     (obs_pad, 128) bf16, w_slab (4, 128, 128) bf16,
      b_slab (5, 1, 128) f32,     w_out (128, 8) bf16,  b_out (1, 8) f32.
    """
    obs_pad = _round_up(obs_dim, 8)
    layers = [
        (params["pw1"], params["pb1"]),
        (params["pw2"], params["pb2"]),
        (params["pw3"], params["pb3"]),
        (params["w1"], params["b1"]),
        (params["w2"], params["b2"]),
        (params["w3"], params["b3"]),
    ]

    # Layer 0: its own (obs_pad, LANE) block so the input needs no 128-lane pad.
    w0_raw, b0_raw = layers[0]
    fi0, fo0 = w0_raw.shape
    w0 = jnp.zeros((obs_pad, LANE), jnp.bfloat16)
    w0 = w0.at[:fi0, :fo0].set(w0_raw.astype(jnp.bfloat16))

    w_slab = jnp.zeros((4, LANE, LANE), jnp.bfloat16)
    b_slab = jnp.zeros((5, 1, LANE), jnp.float32)
    b_slab = b_slab.at[0, :, :fo0].set(b0_raw.reshape(1, -1).astype(jnp.float32))
    for k in range(1, 5):
        w, b = layers[k]
        fi, fo = w.shape
        w_slab = w_slab.at[k - 1, :fi, :fo].set(w.astype(jnp.bfloat16))
        b_slab = b_slab.at[k, :, :fo].set(b.reshape(1, -1).astype(jnp.float32))

    # Layer 5: only 2*action_dim (padded to OUT_PAD) output lanes.
    w5, b5 = layers[5]
    fi5, fo5 = w5.shape
    assert fo5 == 2 * action_dim <= OUT_PAD
    w_out = jnp.zeros((LANE, OUT_PAD), jnp.bfloat16)
    w_out = w_out.at[:fi5, :fo5].set(w5.astype(jnp.bfloat16))
    b_out = jnp.zeros((1, OUT_PAD), jnp.float32)
    b_out = b_out.at[:, :fo5].set(b5.reshape(1, -1).astype(jnp.float32))
    return w0, w_slab, b_slab, w_out, b_out


def policy_network_forward(x, packed, action_dim=ACTION_DIM):
    """x: (B, obs_dim); packed = pack_policy_params(...). Returns (mu, sigma)."""
    w0, w_slab, b_slab, w_out, b_out = packed
    B, obs_dim = x.shape
    obs_pad = w0.shape[0]
    assert obs_dim <= obs_pad

    # Batch tiling: >=2 grid steps whenever B > 8 (shards across v7x's two TCs),
    # tile_b divides b_pad exactly, and padding waste is <= 8 rows per step.
    b8 = _round_up(max(B, 1), 8)
    n_steps = max(2, pl.cdiv(b8, TILE_B_MAX)) if b8 > 8 else 1
    tile_b = _round_up(pl.cdiv(b8, n_steps), 8)
    b_pad = tile_b * n_steps

    x_pad = jnp.pad(x.astype(jnp.float32),
                    ((0, b_pad - B), (0, obs_pad - obs_dim)))

    out = pl.pallas_call(
        _policy_kernel,
        out_shape=jax.ShapeDtypeStruct((b_pad, OUT_PAD), jnp.float32),
        grid_spec=pltpu.PrefetchScalarGridSpec(
            num_scalar_prefetch=0,
            grid=(n_steps,),
            in_specs=[
                pl.BlockSpec((tile_b, obs_pad), lambda i: (i, 0)),        # x tile
                pl.BlockSpec((obs_pad, LANE), lambda i: (0, 0)),          # w0 (resident)
                pl.BlockSpec((4, LANE, LANE), lambda i: (0, 0, 0)),       # w_slab (resident)
                pl.BlockSpec((5, 1, LANE), lambda i: (0, 0, 0)),          # b_slab (resident)
                pl.BlockSpec((LANE, OUT_PAD), lambda i: (0, 0)),          # w_out (resident)
                pl.BlockSpec((1, OUT_PAD), lambda i: (0, 0)),             # b_out (resident)
            ],
            out_specs=pl.BlockSpec((tile_b, OUT_PAD), lambda i: (i, 0)),
        ),
        compiler_params=pltpu.CompilerParams(
            dimension_semantics=("parallel",)),
    )(x_pad, w0, w_slab, b_slab, w_out, b_out)

    mu = out[:B, :action_dim]
    sigma = out[:B, action_dim:2 * action_dim]
    if B == 1:  # mirror PyTorch .squeeze() (no-op for B > 1)
        mu, sigma = mu[0], sigma[0]
    return mu, sigma


def _init_params(key, obs_dim, pre_hidden=64, pre_out=128, hidden=128,
                 action_dim=ACTION_DIM):
    ks = jax.random.split(key, 12)

    def lin(kw, fan_in, fan_out):
        return jax.random.normal(kw, (fan_in, fan_out), jnp.float32) * (1.0 / jnp.sqrt(fan_in))

    def bias(kb, fan_out):
        return jax.random.normal(kb, (1, fan_out), jnp.float32) * 0.01

    return {
        # pre_lstm MLP: obs_dim -> 64 -> 64 -> 128
        "pw1": lin(ks[0], obs_dim, pre_hidden),    "pb1": bias(ks[1], pre_hidden),
        "pw2": lin(ks[2], pre_hidden, pre_hidden), "pb2": bias(ks[3], pre_hidden),
        "pw3": lin(ks[4], pre_hidden, pre_out),    "pb3": bias(ks[5], pre_out),
        # policy head: 128 -> 128 -> 128 -> 2*action_dim
        "w1": lin(ks[6], pre_out, hidden),         "b1": bias(ks[7], hidden),
        "w2": lin(ks[8], hidden, hidden),          "b2": bias(ks[9], hidden),
        "w3": lin(ks[10], hidden, 2 * action_dim), "b3": bias(ks[11], 2 * action_dim),
    }


def _reference_forward(x, p):
    """Mixed-precision reference mirroring the kernel: bf16 matmul operands,
    f32 accumulation, f32 bias/activations."""
    def dense(h, w, b):
        return jnp.dot(h.astype(jnp.bfloat16), w.astype(jnp.bfloat16),
                       preferred_element_type=jnp.float32) + b
    h = jnp.maximum(dense(x, p["pw1"], p["pb1"]), 0.0)
    h = jnp.maximum(dense(h, p["pw2"], p["pb2"]), 0.0)
    f = dense(h, p["pw3"], p["pb3"])
    z = jnp.tanh(dense(f, p["w1"], p["b1"]))
    z = jnp.tanh(dense(z, p["w2"], p["b2"]))
    z = dense(z, p["w3"], p["b3"])
    return jnp.tanh(z[:, :ACTION_DIM]), jax.nn.sigmoid(z[:, ACTION_DIM:])


if __name__ == "__main__":
    B, OBS_DIM = 2, 16
    key = jax.random.PRNGKey(0)
    k_x, k_p = jax.random.split(key)

    x = jax.random.normal(k_x, (B, OBS_DIM), jnp.float32)
    params = _init_params(k_p, OBS_DIM)
    packed = pack_policy_params(params, OBS_DIM)

    fwd = jax.jit(policy_network_forward)
    mu, sigma = fwd(x, packed)
    jax.block_until_ready((mu, sigma))

    mu_ref, sigma_ref = _reference_forward(x, params)
    assert mu.shape == (B, ACTION_DIM) and sigma.shape == (B, ACTION_DIM)
    assert jnp.allclose(mu, mu_ref, atol=2e-3), "mu mismatch vs JAX reference"
    assert jnp.allclose(sigma, sigma_ref, atol=2e-3), "sigma mismatch vs JAX reference"

    print("KERNEL_OK")
</pallas_src>

<mosaic_0001>
module attributes {stable_mosaic.version = 11 : i64} {
  func.func @_policy_kernel(%arg0: i32, %arg1: memref<8x16xf32, #tpu.memory_space<vmem>>, %arg2: memref<16x128xbf16, #tpu.memory_space<vmem>>, %arg3: memref<4x128x128xbf16, #tpu.memory_space<vmem>>, %arg4: memref<5x1x128xf32, #tpu.memory_space<vmem>>, %arg5: memref<128x8xbf16, #tpu.memory_space<vmem>>, %arg6: memref<1x8xf32, #tpu.memory_space<vmem>>, %arg7: memref<8x8xf32, #tpu.memory_space<vmem>>) attributes {dimension_semantics = [#tpu.dimension_semantics<parallel>], iteration_bounds = array<i64: 1>, scalar_prefetch = 0 : i64, scratch_operands = 0 : i64, tpu.core_type = #tpu.core_type<tc>, window_params = [{transform_indices = @transform_0, window_bounds = array<i64: 8, 16>}, {pipeline_mode = #tpu.pipeline_mode<synchronous>, transform_indices = @transform_1, window_bounds = array<i64: 16, 128>}, {pipeline_mode = #tpu.pipeline_mode<synchronous>, transform_indices = @transform_2, window_bounds = array<i64: 4, 128, 128>}, {pipeline_mode = #tpu.pipeline_mode<synchronous>, transform_indices = @transform_3, window_bounds = array<i64: 5, 1, 128>}, {pipeline_mode = #tpu.pipeline_mode<synchronous>, transform_indices = @transform_4, window_bounds = array<i64: 128, 8>}, {pipeline_mode = #tpu.pipeline_mode<synchronous>, transform_indices = @transform_5, window_bounds = array<i64: 1, 8>}, {transform_indices = @transform_6, window_bounds = array<i64: 8, 8>}]} {
    %c0 = arith.constant 0 : index
    %c0_0 = arith.constant 0 : index
    %0 = vector.load %arg1[%c0, %c0_0] : memref<8x16xf32, #tpu.memory_space<vmem>>, vector<8x16xf32>
    %1 = arith.truncf %0 : vector<8x16xf32> to vector<8x16xbf16>
    %c0_1 = arith.constant 0 : index
    %c0_2 = arith.constant 0 : index
    %2 = vector.load %arg2[%c0_1, %c0_2] : memref<16x128xbf16, #tpu.memory_space<vmem>>, vector<16x128xbf16>
    %cst = arith.constant dense<0.000000e+00> : vector<8x128xf32>
    %3 = tpu.matmul %1, %2, %cst {dimension_numbers = #tpu.dot_dimension_numbers<[1], [0], [0], [1], [0, 0, 1, 1], [], []>} : vector<8x16xbf16>, vector<16x128xbf16>, vector<8x128xf32> -> vector<8x128xf32>
    %c0_3 = arith.constant 0 : index
    %c0_4 = arith.constant 0 : index
    %c0_5 = arith.constant 0 : index
    %4 = vector.load %arg4[%c0_3, %c0_4, %c0_5] : memref<5x1x128xf32, #tpu.memory_space<vmem>>, vector<1x1x128xf32>
    %5 = vector.shape_cast %4 : vector<1x1x128xf32> to vector<1x128xf32>
    %6 = vector.broadcast %5 : vector<1x128xf32> to vector<8x128xf32>
    %7 = arith.addf %3, %6 : vector<8x128xf32>
    %cst_6 = arith.constant 0.000000e+00 : f32
    %8 = vector.broadcast %cst_6 : f32 to vector<8x128xf32>
    %9 = arith.maximumf %7, %8 : vector<8x128xf32>
    %10 = arith.truncf %9 : vector<8x128xf32> to vector<8x128xbf16>
    %c0_7 = arith.constant 0 : index
    %c0_8 = arith.constant 0 : index
    %c0_9 = arith.constant 0 : index
    %11 = vector.load %arg3[%c0_7, %c0_8, %c0_9] : memref<4x128x128xbf16, #tpu.memory_space<vmem>>, vector<1x128x128xbf16>
    %12 = vector.shape_cast %11 : vector<1x128x128xbf16> to vector<128x128xbf16>
    %cst_10 = arith.constant dense<0.000000e+00> : vector<8x128xf32>
    %13 = tpu.matmul %10, %12, %cst_10 {dimension_numbers = #tpu.dot_dimension_numbers<[1], [0], [0], [1], [0, 0, 1, 1], [], []>} : vector<8x128xbf16>, vector<128x128xbf16>, vector<8x128xf32> -> vector<8x128xf32>
    %c1 = arith.constant 1 : index
    %c0_11 = arith.constant 0 : index
    %c0_12 = arith.constant 0 : index
    %14 = vector.load %arg4[%c1, %c0_11, %c0_12] : memref<5x1x128xf32, #tpu.memory_space<vmem>>, vector<1x1x128xf32>
    %15 = vector.shape_cast %14 : vector<1x1x128xf32> to vector<1x128xf32>
    %16 = vector.broadcast %15 : vector<1x128xf32> to vector<8x128xf32>
    %17 = arith.addf %13, %16 : vector<8x128xf32>
    %cst_13 = arith.constant 0.000000e+00 : f32
    %18 = vector.broadcast %cst_13 : f32 to vector<8x128xf32>
    %19 = arith.maximumf %17, %18 : vector<8x128xf32>
    %20 = arith.truncf %19 : vector<8x128xf32> to vector<8x128xbf16>
    %c1_14 = arith.constant 1 : index
    %c0_15 = arith.constant 0 : index
    %c0_16 = arith.constant 0 : index
    %21 = vector.load %arg3[%c1_14, %c0_15, %c0_16] : memref<4x128x128xbf16, #tpu.memory_space<vmem>>, vector<1x128x128xbf16>
    %22 = vector.shape_cast %21 : vector<1x128x128xbf16> to vector<128x128xbf16>
    %cst_17 = arith.constant dense<0.000000e+00> : vector<8x128xf32>
    %23 = tpu.matmul %20, %22, %cst_17 {dimension_numbers = #tpu.dot_dimension_numbers<[1], [0], [0], [1], [0, 0, 1, 1], [], []>} : vector<8x128xbf16>, vector<128x128xbf16>, vector<8x128xf32> -> vector<8x128xf32>
    %c2 = arith.constant 2 : index
    %c0_18 = arith.constant 0 : index
    %c0_19 = arith.constant 0 : index
    %24 = vector.load %arg4[%c2, %c0_18, %c0_19] : memref<5x1x128xf32, #tpu.memory_space<vmem>>, vector<1x1x128xf32>
    %25 = vector.shape_cast %24 : vector<1x1x128xf32> to vector<1x128xf32>
    %26 = vector.broadcast %25 : vector<1x128xf32> to vector<8x128xf32>
    %27 = arith.addf %23, %26 : vector<8x128xf32>
    %28 = arith.truncf %27 : vector<8x128xf32> to vector<8x128xbf16>
    %c2_20 = arith.constant 2 : index
    %c0_21 = arith.constant 0 : index
    %c0_22 = arith.constant 0 : index
    %29 = vector.load %arg3[%c2_20, %c0_21, %c0_22] : memref<4x128x128xbf16, #tpu.memory_space<vmem>>, vector<1x128x128xbf16>
    %30 = vector.shape_cast %29 : vector<1x128x128xbf16> to vector<128x128xbf16>
    %cst_23 = arith.constant dense<0.000000e+00> : vector<8x128xf32>
    %31 = tpu.matmul %28, %30, %cst_23 {dimension_numbers = #tpu.dot_dimension_numbers<[1], [0], [0], [1], [0, 0, 1, 1], [], []>} : vector<8x128xbf16>, vector<128x128xbf16>, vector<8x128xf32> -> vector<8x128xf32>
    %c3 = arith.constant 3 : index
    %c0_24 = arith.constant 0 : index
    %c0_25 = arith.constant 0 : index
    %32 = vector.load %arg4[%c3, %c0_24, %c0_25] : memref<5x1x128xf32, #tpu.memory_space<vmem>>, vector<1x1x128xf32>
    %33 = vector.shape_cast %32 : vector<1x1x128xf32> to vector<1x128xf32>
    %34 = vector.broadcast %33 : vector<1x128xf32> to vector<8x128xf32>
    %35 = arith.addf %31, %34 : vector<8x128xf32>
    %36 = math.tanh %35 : vector<8x128xf32>
    %37 = arith.truncf %36 : vector<8x128xf32> to vector<8x128xbf16>
    %c3_26 = arith.constant 3 : index
    %c0_27 = arith.constant 0 : index
    %c0_28 = arith.constant 0 : index
    %38 = vector.load %arg3[%c3_26, %c0_27, %c0_28] : memref<4x128x128xbf16, #tpu.memory_space<vmem>>, vector<1x128x128xbf16>
    %39 = vector.shape_cast %38 : vector<1x128x128xbf16> to vector<128x128xbf16>
    %cst_29 = arith.constant dense<0.000000e+00> : vector<8x128xf32>
    %40 = tpu.matmul %37, %39, %cst_29 {dimension_numbers = #tpu.dot_dimension_numbers<[1], [0], [0], [1], [0, 0, 1, 1], [], []>} : vector<8x128xbf16>, vector<128x128xbf16>, vector<8x128xf32> -> vector<8x128xf32>
    %c4 = arith.constant 4 : index
    %c0_30 = arith.constant 0 : index
    %c0_31 = arith.constant 0 : index
    %41 = vector.load %arg4[%c4, %c0_30, %c0_31] : memref<5x1x128xf32, #tpu.memory_space<vmem>>, vector<1x1x128xf32>
    %42 = vector.shape_cast %41 : vector<1x1x128xf32> to vector<1x128xf32>
    %43 = vector.broadcast %42 : vector<1x128xf32> to vector<8x128xf32>
    %44 = arith.addf %40, %43 : vector<8x128xf32>
    %45 = math.tanh %44 : vector<8x128xf32>
    %46 = arith.truncf %45 : vector<8x128xf32> to vector<8x128xbf16>
    %c0_32 = arith.constant 0 : index
    %c0_33 = arith.constant 0 : index
    %47 = vector.load %arg5[%c0_32, %c0_33] : memref<128x8xbf16, #tpu.memory_space<vmem>>, vector<128x8xbf16>
    %cst_34 = arith.constant dense<0.000000e+00> : vector<8x8xf32>
    %48 = tpu.matmul %46, %47, %cst_34 {dimension_numbers = #tpu.dot_dimension_numbers<[1], [0], [0], [1], [0, 0, 1, 1], [], []>} : vector<8x128xbf16>, vector<128x8xbf16>, vector<8x8xf32> -> vector<8x8xf32>
    %c0_35 = arith.constant 0 : index
    %c0_36 = arith.constant 0 : index
    %49 = vector.load %arg6[%c0_35, %c0_36] : memref<1x8xf32, #tpu.memory_space<vmem>>, vector<1x8xf32>
    %50 = vector.broadcast %49 : vector<1x8xf32> to vector<8x8xf32>
    %51 = arith.addf %48, %50 : vector<8x8xf32>
    %52 = tpu.iota {dimensions = array<i32: 1>} : vector<8x8xi32>
    %c3_i32 = arith.constant 3 : i32
    %53 = vector.broadcast %c3_i32 : i32 to vector<8x8xi32>
    %54 = arith.cmpi slt, %52, %53 : vector<8x8xi32>
    %55 = math.tanh %51 : vector<8x8xf32>
    %56 = arith.negf %51 : vector<8x8xf32>
    %57 = math.exp %56 : vector<8x8xf32>
    %cst_37 = arith.constant 1.000000e+00 : f32
    %58 = vector.broadcast %cst_37 : f32 to vector<8x8xf32>
    %59 = arith.addf %58, %57 : vector<8x8xf32>
    %60 = arith.divf %58, %59 : vector<8x8xf32>
    %61 = arith.select %54, %55, %60 : vector<8x8xi1>, vector<8x8xf32>
    %c0_38 = arith.constant 0 : index
    %c0_39 = arith.constant 0 : index
    %62 = vector.load %arg7[%c0_38, %c0_39] : memref<8x8xf32, #tpu.memory_space<vmem>>, vector<8x8xf32>
    tpu.vector_store %arg7[%c0_38, %c0_39], %61 {strides = array<i32>} : memref<8x8xf32, #tpu.memory_space<vmem>>, vector<8x8xf32>,
    return
  }
  func.func @transform_0(%arg0: i32) -> (i32, i32) {
    %c0_i32 = arith.constant 0 : i32
    %c0_i32_0 = arith.constant 0 : i32
    return %arg0, %c0_i32 : i32, i32
  }
  func.func @transform_1(%arg0: i32) -> (i32, i32) {
    %c0_i32 = arith.constant 0 : i32
    %c0_i32_0 = arith.constant 0 : i32
    %c0_i32_1 = arith.constant 0 : i32
    return %c0_i32, %c0_i32_0 : i32, i32
  }
  func.func @transform_2(%arg0: i32) -> (i32, i32, i32) {
    %c0_i32 = arith.constant 0 : i32
    %c0_i32_0 = arith.constant 0 : i32
    %c0_i32_1 = arith.constant 0 : i32
    %c0_i32_2 = arith.constant 0 : i32
    return %c0_i32, %c0_i32_0, %c0_i32_1 : i32, i32, i32
  }
  func.func @transform_3(%arg0: i32) -> (i32, i32, i32) {
    %c0_i32 = arith.constant 0 : i32
    %c0_i32_0 = arith.constant 0 : i32
    %c0_i32_1 = arith.constant 0 : i32
    %c0_i32_2 = arith.constant 0 : i32
    return %c0_i32, %c0_i32_0, %c0_i32_1 : i32, i32, i32
  }
  func.func @transform_4(%arg0: i32) -> (i32, i32) {
    %c0_i32 = arith.constant 0 : i32
    %c0_i32_0 = arith.constant 0 : i32
    %c0_i32_1 = arith.constant 0 : i32
    return %c0_i32, %c0_i32_0 : i32, i32
  }
  func.func @transform_5(%arg0: i32) -> (i32, i32) {
    %c0_i32 = arith.constant 0 : i32
    %c0_i32_0 = arith.constant 0 : i32
    %c0_i32_1 = arith.constant 0 : i32
    return %c0_i32, %c0_i32_0 : i32, i32
  }
  func.func @transform_6(%arg0: i32) -> (i32, i32) {
    %c0_i32 = arith.constant 0 : i32
    %c0_i32_0 = arith.constant 0 : i32
    return %arg0, %c0_i32 : i32, i32
  }
}

</mosaic_0001>

<bundles_post_ra>
// kernel: policy_network_forward.1
= control target key start
LH: loop header
LB: loop body
LE: loop exit
PB: predicated region body
PF: predicated region fallthrough
CT: control target
= control target key end

     0   :  { %11 = vsyncpa [#allocation3], 0  ;;  %s779_s24 = smov [#allocation2]   ;;  %s780_s26 = smov 64   ;;  %s871_s0 = inlined_call_operand.vmem [shape: f32[8,16], index: 0, kind: input, shape index: {}]   ;;  %s872_s1 = inlined_call_operand.vmem [shape: bf16[16,128], index: 1, kind: input, shape index: {}]   ;;  %s873_s2 = inlined_call_operand.hbm [shape: bf16[4,128,128], index: 2, kind: input, shape index: {}]   ;;  %s874_s3 = inlined_call_operand.vmem [shape: f32[5,1,128], index: 3, kind: input, shape index: {}]   ;;  %s875_s4 = inlined_call_operand.vmem [shape: bf16[128,8], index: 4, kind: input, shape index: {}]   ;;  %s876_s5 = inlined_call_operand.vmem [shape: f32[1,8], index: 5, kind: input, shape index: {}]   ;;  %s877_s6 = inlined_call_operand.vmem [shape: f32[8,8], index: 6, kind: output, shape index: {}]  }
   0x1   :  { %s20_s23 = sshll.u32 %s873_s2, 4  ;;  %s22_s25 = sshll.u32 %s779_s24, 4  ;;  %s21_s23 = int_to_ptr.hbm [resolvable:$true] %s20_s23  ;;  %s23_s25 = int_to_ptr.vmem [resolvable:$true] %s22_s25 }
   0x2   :  { %s781_s27 = smov 4  }
   0x3   :  { %28 = dma.hbm_to_vmem [thread:$0]  %s21_s23, 4096, %s23_s25, [#allocation3], %s780_s26, %s780_s26, %s781_s27  }
   0x4   :  { %777 = dma.done.wait [#allocation3], 4096  }
   0x5   :  { %778 = vsyncadd [#allocation3], 4294963200  ;;  %v693_v0 = vld [vmem:[%s872_s1] sm:$0xff]  ;;  %v701_v2 = vld [vmem:[#allocation2 + $0x38] sm:$0xff]  ;;  %vm54_vm0 = vcmask 130048   ;;  %vm516_vm6 = vcmask 64512  }
   0x6   :  { %v40_v1 = vld [vmem:[%s871_s0] sm:$0xff]  ;;  %65 = vmatpush.bf16.msra.mxu0 %v693_v0  ;;  %142 = vmatpush.bf16.msra.mxu1 %v701_v2  ;;  %v700_v4 = vld [vmem:[#allocation2 + $0x30] sm:$0xff]  ;;  %v699_v5 = vld [vmem:[#allocation2 + $0x28] sm:$0xff] }
   0x7   :  { %v41_v3 = vpack.c.bf16 %v40_v1, %v40_v1  ;;  %v698_v6 = vld [vmem:[#allocation2 + $0x20] sm:$0xff]  ;;  %v697_v7 = vld [vmem:[#allocation2 + $0x18] sm:$0xff]  ;;  %v696_v8 = vld [vmem:[#allocation2 + $0x10] sm:$0xff] }
   0x8   :  { %v695_v9 = vld [vmem:[#allocation2 + $0x8] sm:$0xff]  ;;  %v694_v10 = vld [vmem:[#allocation2] sm:$0xff]  ;;  %v709_v11 = vld [vmem:[#allocation2 + $0x78] sm:$0xff] }
   0x9   :  { %527 = vmatmul.msk.bf16.vlgmr.msra.gmra.mxu0 %vm54_vm0, %v41_v3  ;;  %227 = vmatpush.bf16.msra.mxu2 %v709_v11  ;;  %v708_v12 = vld [vmem:[#allocation2 + $0x70] sm:$0xff]  ;;  %v707_v13 = vld [vmem:[#allocation2 + $0x68] sm:$0xff]  ;;  %v706_v14 = vld [vmem:[#allocation2 + $0x60] sm:$0xff] }
   0xa   :  { %143 = vmatpush.bf16.msra.mxu1 %v700_v4  ;;  %v705_v15 = vld [vmem:[#allocation2 + $0x58] sm:$0xff]  ;;  %v704_v16 = vld [vmem:[#allocation2 + $0x50] sm:$0xff]  ;;  %v737_v17 = vld [vmem:[%s874_s3] ss:$0 sm:$0xff] }
   0xb   :  { %v703_v23 = vld [vmem:[#allocation2 + $0x48] sm:$0xff]  ;;  %v702_v24 = vld [vmem:[#allocation2 + $0x40] sm:$0xff]  ;;  %v717_v25 = vld [vmem:[#allocation2 + $0xb8] sm:$0xff] }
   0xc   :  { %311 = vmatpush.bf16.msra.mxu3 %v717_v25  ;;  %v716_v26 = vld [vmem:[#allocation2 + $0xb0] sm:$0xff]  ;;  %v715_v27 = vld [vmem:[#allocation2 + $0xa8] sm:$0xff]  ;;  %v714_v28 = vld [vmem:[#allocation2 + $0xa0] sm:$0xff] }
   0xd   :  { %228 = vmatpush.bf16.msra.mxu2 %v708_v12  ;;  %v713_v29 = vld [vmem:[#allocation2 + $0x98] sm:$0xff]  ;;  %v712_v30 = vld [vmem:[#allocation2 + $0x90] sm:$0xff]  ;;  %v738_v31 = vld [vmem:[%s874_s3 + $0x1] ss:$0 sm:$0xff] }
   0xe   :  { %144 = vmatpush.bf16.msra.mxu1 %v699_v5  ;;  %v711_v32 = vld [vmem:[#allocation2 + $0x88] sm:$0xff]  ;;  %v710_v38 = vld [vmem:[#allocation2 + $0x80] sm:$0xff]  ;;  %v725_v39 = vld [vmem:[#allocation2 + $0xf8] sm:$0xff] }
   0xf   :  { %396 = vmatpush.bf16.msrb.mxu0 %v725_v39  ;;  %v724_v40 = vld [vmem:[#allocation2 + $0xf0] sm:$0xff]  ;;  %v723_v41 = vld [vmem:[#allocation2 + $0xe8] sm:$0xff]  ;;  %v722_v42 = vld [vmem:[#allocation2 + $0xe0] sm:$0xff] }
  0x10   :  { %312 = vmatpush.bf16.msra.mxu3 %v716_v26  ;;  %v721_v43 = vld [vmem:[#allocation2 + $0xd8] sm:$0xff]  ;;  %v739_v44 = vld [vmem:[%s874_s3 + $0x2] ss:$0 sm:$0xff]  ;;  %v720_v49 = vld [vmem:[#allocation2 + $0xd0] sm:$0xff] }
  0x11   :  { %229 = vmatpush.bf16.msra.mxu2 %v707_v13  ;;  %v719_v50 = vld [vmem:[#allocation2 + $0xc8] sm:$0xff]  ;;  %v718_v51 = vld [vmem:[#allocation2 + $0xc0] sm:$0xff]  ;;  %v733_v52 = vld [vmem:[%s875_s4 + $0x38] sm:$0xff] }
  0x12   :  { %145 = vmatpush.bf16.msra.mxu1 %v698_v6  ;;  %v732_v53 = vld [vmem:[%s875_s4 + $0x30] sm:$0xff]  ;;  %v731_v54 = vld [vmem:[%s875_s4 + $0x28] sm:$0xff]  ;;  %v730_v55 = vld [vmem:[%s875_s4 + $0x20] sm:$0xff] }
  0x13   :  { %397 = vmatpush.bf16.msrb.mxu0 %v724_v40  ;;  %v729_v56 = vld [vmem:[%s875_s4 + $0x18] sm:$0xff]  ;;  %v740_v57 = vld [vmem:[%s874_s3 + $0x3] ss:$0 sm:$0xff]  ;;  %v728_v63 = vld [vmem:[%s875_s4 + $0x10] sm:$0xff] }
  0x14   :  { %313 = vmatpush.bf16.msra.mxu3 %v715_v27  ;;  %v727_v0 = vld [vmem:[%s875_s4 + $0x8] sm:$0xff]  ;;  %v726_v1 = vld [vmem:[%s875_s4] sm:$0xff] }
  0x15   :  { %230 = vmatpush.bf16.msra.mxu2 %v706_v14  ;;  %v741_v2 = vld [vmem:[%s874_s3 + $0x4] ss:$0 sm:$0xff] }
  0x16   :  { %146 = vmatpush.bf16.msra.mxu1 %v697_v7 }
  0x17   :  { %398 = vmatpush.bf16.msrb.mxu0 %v723_v41 }
  0x18   :  { %314 = vmatpush.bf16.msra.mxu3 %v714_v28 }
  0x19   :  { %231 = vmatpush.bf16.msra.mxu2 %v705_v15 }
  0x1a   :  { %147 = vmatpush.bf16.msra.mxu1 %v696_v8  ;;  %v742_v8 = vld [vmem:[%s876_s5] ss:$0 sm:$0xff] }
  0x1b   :  { %399 = vmatpush.bf16.msrb.mxu0 %v722_v42 }
  0x1c   :  { %315 = vmatpush.bf16.msra.mxu3 %v713_v29 }
  0x1d   :  { %232 = vmatpush.bf16.msra.mxu2 %v704_v16  ;;  %v492_v16 = vlaneseq }
  0x1e   :  { %148 = vmatpush.bf16.msra.mxu1 %v695_v9 }
  0x1f   :  { %400 = vmatpush.bf16.msrb.mxu0 %v721_v43 }
  0x20   :  { %316 = vmatpush.bf16.msra.mxu3 %v712_v30 }
  0x21   :  { %233 = vmatpush.bf16.msra.mxu2 %v703_v23 }
  0x22   :  { %149 = vmatpush.bf16.msra.mxu1 %v694_v10 }
  0x23   :  { %401 = vmatpush.bf16.msrb.mxu0 %v720_v49 }
  0x24   :  { %317 = vmatpush.bf16.msra.mxu3 %v711_v32 }
  0x25   :  { %234 = vmatpush.bf16.msra.mxu2 %v702_v24 }
  0x26   :  { %479 = vmatpush.bf16.msrb.mxu1 %v733_v52 }
  0x27   :  { %402 = vmatpush.bf16.msrb.mxu0 %v719_v50 }
  0x28   :  { %318 = vmatpush.bf16.msra.mxu3 %v710_v38 }
  0x2a   :  { %480 = vmatpush.bf16.msrb.mxu1 %v732_v53 }
  0x2b   :  { %403 = vmatpush.bf16.msrb.mxu0 %v718_v51 }
  0x2e   :  { %481 = vmatpush.bf16.msrb.mxu1 %v731_v54 }
  0x32   :  { %482 = vmatpush.bf16.msrb.mxu1 %v730_v55 }
  0x36   :  { %483 = vmatpush.bf16.msrb.mxu1 %v729_v56 }
  0x3a   :  { %484 = vmatpush.bf16.msrb.mxu1 %v728_v63 }
  0x3e   :  { %485 = vmatpush.bf16.msrb.mxu1 %v727_v0 }
  0x42   :  { %486 = vmatpush.bf16.msrb.mxu1 %v726_v1 }
  0x86   :  { %v67_v18 = vpop.f32.mrf.mxu0 }
  0x87   :  { %v68_v19 = vadd.f32 %v737_v17, %v67_v18 }
  0x89   :  { %v71_v20 = vmax.f32 %v68_v19, 0.0  ;;  %v493_v19 = vand.u32 127, %v492_v16 }
  0x8b   :  { %v72_v21 = vpack.c.bf16 %v71_v20, %v71_v20  ;;  %vm494_vm3 = vcmp.lt.s32.totalorder %v493_v19, 3 }
  0x8d   :  { %150 = vmatmul.bf16.vlgmr.msra.gmra.mxu1 %v72_v21 }
  0x8e   :  { %v69_v22 = vpop.f32.mrf.mxu0 }
 0x10a   :  { %v151_v33 = vpop.f32.mrf.mxu1 }
 0x10b   :  { %v152_v34 = vadd.f32 %v738_v31, %v151_v33 }
 0x10d   :  { %v155_v35 = vmax.f32 %v152_v34, 0.0 }
 0x10f   :  { %v156_v36 = vpack.c.bf16 %v155_v35, %v155_v35 }
 0x111   :  { %235 = vmatmul.bf16.vlgmr.msra.gmra.mxu2 %v156_v36 }
 0x112   :  { %v153_v37 = vpop.f32.mrf.mxu1 }
 0x194   :  { %v236_v45 = vpop.f32.mrf.mxu2 }
 0x195   :  { %v237_v46 = vadd.f32 %v739_v44, %v236_v45 }
 0x197   :  { %v240_v47 = vpack.c.bf16 %v237_v46, %v237_v46 }
 0x199   :  { %319 = vmatmul.bf16.vlgmr.msra.gmra.mxu3 %v240_v47 }
 0x19c   :  { %v238_v48 = vpop.f32.mrf.mxu2 }
 0x21c   :  { %v320_v58 = vpop.f32.mrf.mxu3 }
 0x21d   :  { %v321_v59 = vadd.f32 %v740_v57, %v320_v58 }
 0x21f   :  { %743 = vtanh.f32 %v321_v59 }
 0x224   :  { %v322_v60 = vpop.f32.mrf.mxu3 }
 0x225   :  { %v744_v61 = vpop.eup %743 }
 0x226   :  { %v325_v62 = vpack.c.bf16 %v744_v61, %v744_v61 }
 0x228   :  { %404 = vmatmul.bf16.vlgmr.msrb.gmra.mxu0 %v325_v62 }
 0x2a5   :  { %v405_v3 = vpop.f32.mrf.mxu0 }
 0x2a6   :  { %v406_v4 = vadd.f32 %v741_v2, %v405_v3 }
 0x2a8   :  { %745 = vtanh.f32 %v406_v4 }
 0x2ad   :  { %v407_v5 = vpop.f32.mrf.mxu0 }
 0x2ae   :  { %v746_v6 = vpop.eup %745 }
 0x2af   :  { %v410_v7 = vpack.c.bf16 %v746_v6, %v746_v6 }
 0x2b1   :  { %487 = vmatmul.bf16.vlgmr.msrb.gmra.mxu1 %v410_v7 }
 0x32e   :  { %v488_v9 = vpop.f32.mrf.mxu1 }
 0x32f   :  { %v489_v10 = vadd.f32 %v742_v8, %v488_v9 }
 0x331   :  { %v692_v11 = vmul.f32 -1.442695, %v489_v10 }
 0x333   :  { %747 = vpow2.f32 %v692_v11 }
 0x336   :  { %v490_v12 = vpop.f32.mrf.mxu1 }
 0x339   :  { %v748_v13 = vpop.eup %747 }
 0x33a   :  { %v499_v14 = vadd.f32 1.0, %v748_v13 }
 0x33c   :  { %749 = vrcp.f32 %v499_v14  ;;  %v511_v20 = vand.u32 2147483648, %v499_v14  ;;  %v509_v22 = vand.u32 2147483647, %v499_v14  ;;  %vm505_vm2 = vweird.f32 %v499_v14 }
 0x33d   :  { %751 = vtanh.f32 %v489_v10 }
 0x33e   :  { %v512_v24 = vor.u32 1.1754944e-38, %v511_v20  ;;  %vm510_vm5 = vcmp.eq.f32.partialorder %v509_v22, 8.507059e+37 }
 0x342   :  { %v750_v15 = vpop.eup %749 }
 0x343   :  { %v501_v17 = vmul.f32 %v750_v15, %v499_v14  ;;  %vm506_vm1 = vweird.f32 %v750_v15  ;;  %v752_v26 = vpop.eup %751 }
 0x344   :  { %vm507_vm4 = vmor %vm505_vm2, %vm506_vm1 }
 0x345   :  { %v502_v18 = vsub.f32 1.0, %v501_v17 }
 0x347   :  { %v503_v21 = vmul.f32 %v750_v15, %v502_v18 }
 0x349   :  { %v504_v23 = vadd.f32 %v750_v15, %v503_v21 }
 0x34b   :  { %v508_v25 = vsel %vm507_vm4, %v750_v15, %v504_v23 }
 0x34c   :  { %v513_v27 = vsel %vm510_vm5, %v512_v24, %v508_v25 }
 0x34d   :  { %v515_v28 = vsel %vm494_vm3, %v752_v26, %v513_v27 }
 0x34e   :  { %517 = vst.msk [vmem:[%s877_s6] sm:$0xff] %vm516_vm6, %v515_v28 }
 0x34f   :  { %522 = vsyncpa [#allocation3], 1 }

</bundles_post_ra>
